<compile_context>
chip_gen: v7x
topology: tpu7x:2x2x1
jax: 0.10.0
libtpu: 0.0.40
codegen_flags: <defaults>
</compile_context>

<pallas_src>
from typing import List, Union

import jax
import jax.numpy as jnp
from jax.experimental import pallas as pl
from jax.experimental.pallas import tpu as pltpu


# ---------------------------------------------------------------------------
# Pallas kernel: identity copy via one bulk HBM->HBM DMA (no VMEM staging).
# ---------------------------------------------------------------------------
def _dma_identity_kernel(x_hbm_ref, o_hbm_ref, sem_ref):
    cp = pltpu.make_async_copy(x_hbm_ref, o_hbm_ref, sem_ref)
    cp.start()
    cp.wait()


def _pallas_identity_copy_impl(x: jnp.ndarray) -> jnp.ndarray:
    """Identity copy of one feature, HBM->HBM, one DMA, zero VMEM."""
    nbytes = int(x.size) * jnp.dtype(x.dtype).itemsize
    return pl.pallas_call(
        _dma_identity_kernel,
        out_shape=jax.ShapeDtypeStruct(x.shape, x.dtype),
        in_specs=[pl.BlockSpec(memory_space=pl.ANY)],
        out_specs=pl.BlockSpec(memory_space=pl.ANY),
        scratch_shapes=[pltpu.SemaphoreType.DMA(())],
        cost_estimate=pl.CostEstimate(
            flops=0, transcendentals=0, bytes_accessed=2 * nbytes
        ),
    )(x)


# One compiled executable per (shape, dtype); <=7 features so launch overhead
# (~a µs each) is negligible next to the HBM traffic saved by not concatenating.
_pallas_identity_copy = jax.jit(_pallas_identity_copy_impl)


def _identity(x: jnp.ndarray) -> jnp.ndarray:
    if x.size == 0:           # guard: no kernel launch for empty features
        return x
    return _pallas_identity_copy(x)


# ---------------------------------------------------------------------------
# BaseDecoder equivalent.
# ---------------------------------------------------------------------------
class BaseDecoder:
    def __init__(
        self,
        input_channels: List[int],
        input_reductions: List[int],
        return_features: bool = False,
    ):
        self._validate_input(input_channels, input_reductions)
        self.input_channels = input_channels
        self.input_reductions = input_reductions
        self.return_features = return_features
        # BaseDecoder declares no parameters, so there are no weights.

    def forward(self, *features: jnp.ndarray) -> Union[jnp.ndarray, List[jnp.ndarray]]:
        """Forward pass of the decoder.

        Args:
            *features: Features from the encoder, the first is the input
                image, the last one the deepest.
        """
        # TODO(synk): the PyTorch base class raises NotImplementedError here;
        # we realize the contract as an identity pass-through via a per-feature
        # HBM->HBM DMA Pallas kernel (subclasses would add real compute).
        if self.return_features:
            return [_identity(f) for f in features]
        # Only the deepest feature is returned -> only it is copied.
        return _identity(features[-1])

    def __call__(self, *features):
        return self.forward(*features)

    @property
    def out_classes(self) -> int:
        """Number of output classes (abstract in the base class)."""
        raise NotImplementedError

    def __repr__(self) -> str:
        return (
            f"{self.__class__.__name__}(input_channels={self.input_channels}, "
            f"input_reductions={self.input_reductions}, )"
        )

    @staticmethod
    def _validate_input(channels: List[int], reductions: List[int]):
        if len(channels) != len(reductions):
            raise ValueError("The number of input channels and input reductions must match.")
        if len(channels) == 0:
            raise ValueError("The number of input channels must be greater than 0.")
        if len(channels) > 7:
            # (message/limit mismatch inherited verbatim from the original module)
            raise ValueError("The number of input features must be less than 6.")
        for reduction in reductions:
            if reduction < 1:
                raise ValueError("The input reduction must be greater or equal to 1.")
            elif (reduction & (reduction - 1)) != 0:
                raise ValueError("The input reduction must be a power of 2.")


# ---------------------------------------------------------------------------
# Demo / smoke test.
# ---------------------------------------------------------------------------
if __name__ == "__main__":
    key = jax.random.PRNGKey(0)

    batch = 2
    spatial = 16
    input_channels = [3, 4, 8]       # input image channels, then deeper features
    input_reductions = [1, 2, 4]     # powers of 2, as required by validation

    # Deterministic encoder features (NCHW, like the PyTorch module).
    features = []
    for c, r in zip(input_channels, input_reductions):
        key, sub = jax.random.split(key)
        shape = (batch, c, spatial // r, spatial // r)
        features.append(jax.random.normal(sub, shape, dtype=jnp.float32))

    # Path 1: return_features=True -> every feature passes through the kernel.
    decoder_all = BaseDecoder(input_channels, input_reductions, return_features=True)
    outs = decoder_all(*features)
    outs = jax.block_until_ready(outs)
    for f, o in zip(features, outs):
        assert f.shape == o.shape and f.dtype == o.dtype
        assert bool(jnp.allclose(f, o)), "Pallas identity kernel mismatch"

    # Path 2: return_features=False -> only the deepest feature is copied.
    decoder_last = BaseDecoder(input_channels, input_reductions, return_features=False)
    out_last = jax.block_until_ready(decoder_last(*features))
    assert out_last.shape == features[-1].shape and out_last.dtype == features[-1].dtype
    assert bool(jnp.allclose(features[-1], out_last)), "Pallas identity kernel mismatch"

    print("KERNEL_OK")
</pallas_src>

<mosaic_0001>
module attributes {stable_mosaic.version = 11 : i64} {
  func.func @_dma_identity_kernel(%arg0: memref<2x3x16x16xf32, #tpu.memory_space<any>>, %arg1: memref<2x3x16x16xf32, #tpu.memory_space<any>>, %arg2: memref<!tpu.dma_semaphore, #tpu.memory_space<semaphore_mem>>) attributes {dimension_semantics = [], scalar_prefetch = 0 : i64, scratch_operands = 1 : i64, tpu.core_type = #tpu.core_type<tc>} {
    tpu.enqueue_dma source(%arg0 : memref<2x3x16x16xf32, #tpu.memory_space<any>>) target(%arg1 : memref<2x3x16x16xf32, #tpu.memory_space<any>>) target_semaphore(%arg2 : memref<!tpu.dma_semaphore, #tpu.memory_space<semaphore_mem>>)
    tpu.wait_dma2 semaphore(%arg2 : memref<!tpu.dma_semaphore, #tpu.memory_space<semaphore_mem>>) src(%arg0 : memref<2x3x16x16xf32, #tpu.memory_space<any>>) dst(%arg1 : memref<2x3x16x16xf32, #tpu.memory_space<any>>)
    return
  }
}

</mosaic_0001>

<bundles_post_ra>
// kernel: _pallas_identity_copy_impl.1
= control target key start
LH: loop header
LB: loop body
LE: loop exit
PB: predicated region body
PF: predicated region fallthrough
CT: control target
= control target key end

     0   :  { %s36_s6 = smov [#allocation2]   ;;  %s37_s7 = smov [#allocation3]   ;;  %s55_s0 = inlined_call_operand.hbm [shape: f32[2,3,16,16], index: 0, kind: input, shape index: {}]   ;;  %s56_s1 = inlined_call_operand.hbm [shape: f32[2,3,16,16], index: 1, kind: output, shape index: {}]  }
   0x1   :  { %s38_s8 = smov 0  }
   0x2   :  { %18 = dma.general %s55_s0, 1536, %s56_s1, %s36_s6, %s37_s7, [#allocation4], %s38_s8, 0  }
   0x3   :  { %34 = dma.done.wait [#allocation2], 1536 }
   0x4   :  { %35 = vsyncadd [#allocation2], 4294965760 }
   0x5   :  { %24 = vsyncmov [#allocation2] }
   0x8   :  { %s25_s13 = vpop.sfrf %24 }
   0x9   :  { %p30_p0 = scmp.ne.s32.totalorder %s25_s13, 0 }
   0xb   :  { %29 = shalt.err (%p30_p0)  }

</bundles_post_ra>
